<compile_context>
chip_gen: v6e
topology: v6e:2x2x1
jax: 0.10.0
libtpu: 0.0.40
codegen_flags: <defaults>
</compile_context>

<pallas_src>
import functools

import numpy as np
import jax
import jax.numpy as jnp
from jax.experimental import pallas as pl
from jax.experimental.pallas import tpu as pltpu


# ----------------------------------------------------------------------------
# Fused forward kernel: one grid step covers BB batch rows (BB*T frames).
# ----------------------------------------------------------------------------
def _apl_fused_kernel(x_ref, kt_ref, v_ref,
                      cw_ref, fw_ref, dw_ref, bias_ref,
                      o_ref,
                      *, BB, T, CF2, H2, scale):
    # Packed biases, sliced at lane-aligned static offsets.
    conv_b = bias_ref[:, :CF2]                        # (1, 2*C*F)
    fc_b = bias_ref[:, CF2:CF2 + H2]                  # (1, 2*H)
    dec_b = bias_ref[:, CF2 + H2:]                    # (1, Vp)

    # Both 3x3 convs (acoustic + phonetic) as ONE block-diagonal matmul over
    # the wrapper-side im2row rows, then the fused per-frame FC -> query.
    feat = jnp.maximum(
        jnp.dot(x_ref[...], cw_ref[...], preferred_element_type=jnp.float32)
        + conv_b, 0.0)                                # (BB*T, 2*C*F)
    query = jnp.tanh(
        jnp.dot(feat, fw_ref[...], preferred_element_type=jnp.float32)
        + fc_b)                                       # (BB*T, D)

    # Attention decoder: per batch row inside the block (keys pre-transposed,
    # so no in-kernel transpose).  BB is a small static Python int.
    ctxs = []
    for b in range(BB):
        q_b = query[b * T:(b + 1) * T, :]                                    # (T, D)
        s = jnp.dot(q_b, kt_ref[b], preferred_element_type=jnp.float32) * scale  # (T, L)
        s = s - jnp.max(s, axis=-1, keepdims=True)
        p = jnp.exp(s)
        p = p * pl.reciprocal(jnp.sum(p, axis=-1, keepdims=True), approx=False)
        ctxs.append(jnp.dot(p, v_ref[b], preferred_element_type=jnp.float32))     # (T, D)
    ctx = ctxs[0] if BB == 1 else jnp.concatenate(ctxs, axis=0)              # (BB*T, D)

    # Output projection (vocab padded to lane-dense Vp in the wrapper).
    o_ref[...] = jnp.dot(ctx, dw_ref[...], preferred_element_type=jnp.float32) + dec_b


# ----------------------------------------------------------------------------
# Parameter / input -> kernel-layout transforms (tiny, XLA-side, under jit)
# ----------------------------------------------------------------------------
def _conv_matrix(w, F):
    """w: (C,3,3) -> (3F, C*F): row dy*F+f, col c*F+j holds w[c, dy, f-j+1]
    (zero for out-of-range taps).  Combined with the wrapper-side time im2row
    this reproduces nn.Conv2d(1, C, 3, padding=1) cross-correlation."""
    f = jnp.arange(F)
    j = jnp.arange(F)
    dx = f[:, None] - j[None, :] + 1                  # (F, F)
    valid = (dx >= 0) & (dx <= 2)
    wg = jnp.where(valid[None, None], w[:, :, jnp.clip(dx, 0, 2)], 0.0)  # (C,3,F,F)
    return jnp.transpose(wg, (1, 2, 0, 3)).reshape(3 * F, w.shape[0] * F)


def _im2row_time(x, T):
    """(B, T, F) -> (B, T, 3F): rows [t-1, t, t+1] concatenated, zero-padded."""
    xp = jnp.pad(x, ((0, 0), (1, 1), (0, 0)))
    return jnp.concatenate([xp[:, 0:T], xp[:, 1:T + 1], xp[:, 2:T + 2]], axis=-1)


def _pick_bb(B, T):
    """Batch rows folded per grid step: target BB*T ~ 128 MXU rows while
    keeping >= 2 grid steps so v7x's two TensorCores both get work."""
    target = max(1, 128 // max(T, 1))
    best = 1
    for bb in range(1, B + 1):
        if B % bb or bb > target:
            continue
        if B // bb >= 2 or B < 2:
            best = bb
    return best


def _apl_forward_logits(params, acoustic_input, phonetic_input, phoneme_input):
    B, T, F = acoustic_input.shape
    vocab, E = params["emb"].shape
    C = params["a_conv_w"].shape[0]
    H = params["a_fc_w"].shape[1]            # enc_hidden
    D = params["l_key_w"].shape[1]           # output_size == decoder_size
    CF = C * F
    CF2, H2 = 2 * CF, 2 * H
    Vp = 128 * ((vocab + 127) // 128)        # lane-dense padded vocab

    # --- im2row (time unfold) + acoustic/phonetic concat, flattened over (B,T) ---
    x_unf = jnp.concatenate([_im2row_time(acoustic_input, T),
                             _im2row_time(phonetic_input, T)], axis=-1)   # (B,T,6F)
    x_flat = x_unf.reshape(B * T, 6 * F)

    # --- both convs as ONE block-diagonal (6F, 2CF) matmul weight ---
    conv_w = jnp.zeros((6 * F, CF2), jnp.float32)
    conv_w = conv_w.at[:3 * F, :CF].set(_conv_matrix(params["a_conv_w"], F))
    conv_w = conv_w.at[3 * F:, CF:].set(_conv_matrix(params["p_conv_w"], F))
    conv_b = jnp.concatenate([jnp.repeat(params["a_conv_b"], F),
                              jnp.repeat(params["p_conv_b"], F)])          # (2CF,)

    # --- both per-frame FCs as ONE block-diagonal (2CF, 2H) matmul -> query ---
    fc_w = jnp.zeros((CF2, H2), jnp.float32)
    fc_w = fc_w.at[:CF, :H].set(params["a_fc_w"])
    fc_w = fc_w.at[CF:, H:].set(params["p_fc_w"])
    fc_b = jnp.concatenate([params["a_fc_b"], params["p_fc_b"]])           # (2H,)

    # --- linguistic encoder off the kernel critical path (tiny matmuls) ---
    emb_g = jnp.take(params["emb"], phoneme_input, axis=0)                 # (B, L, E)
    h = jnp.tanh(emb_g @ params["l_fc_w"] + params["l_fc_b"])              # (B, L, hidden)
    keys = h @ params["l_key_w"] + params["l_key_b"]                       # (B, L, D)
    values = h @ params["l_val_w"] + params["l_val_b"]                     # (B, L, D)
    keys_t = jnp.transpose(keys, (0, 2, 1))                                # (B, D, L)
    L = keys.shape[1]

    # --- lane-dense padded output projection + one packed bias buffer ---
    dec_w = jnp.pad(params["dec_w"], ((0, 0), (0, Vp - vocab)))            # (D, Vp)
    dec_b = jnp.pad(params["dec_b"], (0, Vp - vocab))                      # (Vp,)
    bias_pack = jnp.concatenate([conv_b, fc_b, dec_b]).reshape(1, CF2 + H2 + Vp)

    BB = _pick_bb(B, T)
    scale = 1.0 / float(np.sqrt(D))
    kernel = functools.partial(_apl_fused_kernel, BB=BB, T=T, CF2=CF2, H2=H2,
                               scale=scale)

    logits_flat = pl.pallas_call(
        kernel,
        out_shape=jax.ShapeDtypeStruct((B * T, Vp), jnp.float32),
        grid=(B // BB,),
        in_specs=[
            pl.BlockSpec((BB * T, 6 * F), lambda i: (i, 0)),         # im2row rows
            pl.BlockSpec((BB, D, L), lambda i: (i, 0, 0)),           # keys^T per batch
            pl.BlockSpec((BB, L, D), lambda i: (i, 0, 0)),           # values per batch
            pl.BlockSpec((6 * F, CF2), lambda i: (0, 0)),            # fused conv W
            pl.BlockSpec((CF2, H2), lambda i: (0, 0)),               # fused FC W
            pl.BlockSpec((D, Vp), lambda i: (0, 0)),                 # decoder W (padded)
            pl.BlockSpec((1, CF2 + H2 + Vp), lambda i: (0, 0)),      # packed biases
        ],
        out_specs=pl.BlockSpec((BB * T, Vp), lambda i: (i, 0)),
        compiler_params=pltpu.CompilerParams(dimension_semantics=("parallel",)),
    )(x_flat, keys_t, values, conv_w, fc_w, dec_w, bias_pack)

    return logits_flat.reshape(B, T, Vp)[..., :vocab]


apl_forward_logits = jax.jit(_apl_forward_logits)


# ----------------------------------------------------------------------------
# Plain-JAX reference forward pass (mirrors the PyTorch module) for validation.
# ----------------------------------------------------------------------------
def _reference_logits(params, acoustic_input, phonetic_input, phoneme_input):
    F_ = acoustic_input.shape[-1]

    def conv_encode(x, cw, cb, fw, fb):
        y = jax.lax.conv_general_dilated(
            x[:, None, :, :], cw[:, None, :, :], window_strides=(1, 1),
            padding="SAME", dimension_numbers=("NCHW", "OIHW", "NCHW"))
        y = jnp.maximum(y + cb[None, :, None, None], 0.0)             # (B, C, T, F)
        Bb, Cc, Tt, _ = y.shape
        y = jnp.transpose(y, (0, 2, 1, 3)).reshape(Bb, Tt, Cc * F_)
        return jnp.tanh(y @ fw + fb)

    a_enc = conv_encode(acoustic_input, params["a_conv_w"], params["a_conv_b"],
                        params["a_fc_w"], params["a_fc_b"])
    p_enc = conv_encode(phonetic_input, params["p_conv_w"], params["p_conv_b"],
                        params["p_fc_w"], params["p_fc_b"])
    query = jnp.concatenate([a_enc, p_enc], axis=-1)                   # (B, T, D)

    emb_g = jnp.take(params["emb"], phoneme_input, axis=0)
    h = jnp.tanh(emb_g @ params["l_fc_w"] + params["l_fc_b"])
    keys = h @ params["l_key_w"] + params["l_key_b"]
    values = h @ params["l_val_w"] + params["l_val_b"]

    D = keys.shape[-1]
    s = jnp.einsum("btd,bld->btl", query, keys) / jnp.sqrt(jnp.float32(D))
    probs = jax.nn.softmax(s, axis=-1)
    ctx = jnp.einsum("btl,bld->btd", probs, values)
    return ctx @ params["dec_w"] + params["dec_b"]


# ----------------------------------------------------------------------------
# Host-side beam search over per-frame logits (mirrors the original
# .detach().cpu().numpy() post-processing; not a TPU kernel by construction).
# ----------------------------------------------------------------------------
def beam_search_over_frames(logits, beam_width=3, sequence_length=10):
    logits = np.asarray(logits)
    B, T, V = logits.shape
    sequence_length = min(sequence_length, T)
    m = logits.max(axis=-1, keepdims=True)
    logp = logits - m - np.log(np.exp(logits - m).sum(axis=-1, keepdims=True))
    out = []
    for b in range(B):
        beams = [((), 0.0)]
        for t in range(sequence_length):
            lp = logp[b, t]
            cand = []
            for seq, score in beams:
                for v in range(V):
                    cand.append((seq + (v,), score + float(lp[v])))
            cand.sort(key=lambda c: -c[1])
            beams = cand[:beam_width]
        out.append([list(seq) for seq, _ in beams])
    return np.array(out, dtype=np.int32)  # (B, beam_width, sequence_length)


# ----------------------------------------------------------------------------
# Model: parameter init + forward
# ----------------------------------------------------------------------------
def init_params(key, *, input_size, vocab_size, embedding_dim, hidden_size,
                output_size, conv_channels, enc_hidden):
    ks = jax.random.split(key, 16)
    n = lambda k, shape, s=0.1: (s * jax.random.normal(k, shape)).astype(jnp.float32)
    F = input_size
    return {
        # acoustic encoder: Conv2d(1, C, 3, padding=1) + Linear(C*F, enc_hidden)
        "a_conv_w": n(ks[0], (conv_channels, 3, 3)),
        "a_conv_b": n(ks[1], (conv_channels,)),
        "a_fc_w": n(ks[2], (conv_channels * F, enc_hidden)),
        "a_fc_b": n(ks[3], (enc_hidden,)),
        # phonetic encoder: same structure, separate weights
        "p_conv_w": n(ks[4], (conv_channels, 3, 3)),
        "p_conv_b": n(ks[5], (conv_channels,)),
        "p_fc_w": n(ks[6], (conv_channels * F, enc_hidden)),
        "p_fc_b": n(ks[7], (enc_hidden,)),
        # linguistic encoder: Embedding(vocab, E) -> Linear(E, hidden) -> tanh
        #                     -> key/value Linear(hidden, output_size)
        "emb": n(ks[8], (vocab_size, embedding_dim), 1.0),
        "l_fc_w": n(ks[9], (embedding_dim, hidden_size)),
        "l_fc_b": n(ks[10], (hidden_size,)),
        "l_key_w": n(ks[11], (hidden_size, output_size)),
        "l_key_b": n(ks[12], (output_size,)),
        "l_val_w": n(ks[13], (hidden_size, output_size)),
        "l_val_b": n(ks[14], (output_size,)),
        # decoder output projection: Linear(decoder_size, vocab_size)
        "dec_w": n(ks[15], (2 * enc_hidden, vocab_size)),
        "dec_b": jnp.zeros((vocab_size,), jnp.float32),
    }


def apl_model(params, acoustic_input, phonetic_input, phoneme_input,
              beam_width=3, sequence_length=10):
    logits = apl_forward_logits(params, acoustic_input, phonetic_input, phoneme_input)
    logits = jax.block_until_ready(logits)
    # TODO(synk): beam_search_over_frames stays host-side numpy (as in the
    # reference, which already does .detach().cpu().numpy()).
    return beam_search_over_frames(np.asarray(logits), beam_width, sequence_length), logits


if __name__ == "__main__":
    # Small shapes consistent with the forward pass.
    B, T = 2, 16                 # batch, time frames
    input_size = 16              # acoustic/phonetic feature dim (F)
    L = 8                        # phoneme sequence length
    vocab_size = 12
    embedding_dim = 8
    hidden_size = 32
    enc_hidden = 64
    conv_channels = 8
    output_size = 2 * enc_hidden          # keys/values dim == decoder_size
    decoder_size = 2 * enc_hidden         # = 128

    key = jax.random.PRNGKey(0)
    k_param, k_ac, k_ph, k_ids = jax.random.split(key, 4)

    params = init_params(
        k_param, input_size=input_size, vocab_size=vocab_size,
        embedding_dim=embedding_dim, hidden_size=hidden_size,
        output_size=output_size, conv_channels=conv_channels,
        enc_hidden=enc_hidden)

    acoustic_input = jax.random.normal(k_ac, (B, T, input_size), jnp.float32)
    phonetic_input = jax.random.normal(k_ph, (B, T, input_size), jnp.float32)
    phoneme_input = jax.random.randint(k_ids, (B, L), 0, vocab_size)

    sequences, logits = apl_model(params, acoustic_input, phonetic_input, phoneme_input,
                                  beam_width=3, sequence_length=10)
    logits = jax.block_until_ready(logits)

    # Cross-check the fused kernel against the plain-JAX reference forward.
    ref = jax.block_until_ready(
        _reference_logits(params, acoustic_input, phonetic_input, phoneme_input))
    np.testing.assert_allclose(np.asarray(logits), np.asarray(ref), rtol=2e-2, atol=2e-2)

    assert logits.shape == (B, T, vocab_size)
    assert sequences.shape == (B, 3, 10)
    print("KERNEL_OK")
</pallas_src>

<mosaic_0001>
module attributes {stable_mosaic.version = 11 : i64} {
  func.func @_apl_fused_kernel(%arg0: i32, %arg1: memref<16x96xf32, #tpu.memory_space<vmem>>, %arg2: memref<1x128x8xf32, #tpu.memory_space<vmem>>, %arg3: memref<1x8x128xf32, #tpu.memory_space<vmem>>, %arg4: memref<96x256xf32, #tpu.memory_space<vmem>>, %arg5: memref<256x128xf32, #tpu.memory_space<vmem>>, %arg6: memref<128x128xf32, #tpu.memory_space<vmem>>, %arg7: memref<1x512xf32, #tpu.memory_space<vmem>>, %arg8: memref<16x128xf32, #tpu.memory_space<vmem>>) attributes {dimension_semantics = [#tpu.dimension_semantics<parallel>], iteration_bounds = array<i64: 2>, scalar_prefetch = 0 : i64, scratch_operands = 0 : i64, tpu.core_type = #tpu.core_type<tc>, window_params = [{transform_indices = @transform_0, window_bounds = array<i64: 16, 96>}, {transform_indices = @transform_1, window_bounds = array<i64: 1, 128, 8>}, {transform_indices = @transform_2, window_bounds = array<i64: 1, 8, 128>}, {pipeline_mode = #tpu.pipeline_mode<synchronous>, transform_indices = @transform_3, window_bounds = array<i64: 96, 256>}, {pipeline_mode = #tpu.pipeline_mode<synchronous>, transform_indices = @transform_4, window_bounds = array<i64: 256, 128>}, {pipeline_mode = #tpu.pipeline_mode<synchronous>, transform_indices = @transform_5, window_bounds = array<i64: 128, 128>}, {pipeline_mode = #tpu.pipeline_mode<synchronous>, transform_indices = @transform_6, window_bounds = array<i64: 1, 512>}, {transform_indices = @transform_7, window_bounds = array<i64: 16, 128>}]} {
    %c0 = arith.constant 0 : index
    %c0_0 = arith.constant 0 : index
    %0 = vector.load %arg7[%c0, %c0_0] : memref<1x512xf32, #tpu.memory_space<vmem>>, vector<1x256xf32>
    %c0_1 = arith.constant 0 : index
    %c256 = arith.constant 256 : index
    %1 = vector.load %arg7[%c0_1, %c256] : memref<1x512xf32, #tpu.memory_space<vmem>>, vector<1x128xf32>
    %c0_2 = arith.constant 0 : index
    %c384 = arith.constant 384 : index
    %2 = vector.load %arg7[%c0_2, %c384] : memref<1x512xf32, #tpu.memory_space<vmem>>, vector<1x128xf32>
    %c0_3 = arith.constant 0 : index
    %c0_4 = arith.constant 0 : index
    %3 = vector.load %arg1[%c0_3, %c0_4] : memref<16x96xf32, #tpu.memory_space<vmem>>, vector<16x96xf32>
    %c0_5 = arith.constant 0 : index
    %c0_6 = arith.constant 0 : index
    %4 = vector.load %arg4[%c0_5, %c0_6] : memref<96x256xf32, #tpu.memory_space<vmem>>, vector<96x256xf32>
    %cst = arith.constant dense<0.000000e+00> : vector<16x256xf32>
    %5 = tpu.matmul %3, %4, %cst {dimension_numbers = #tpu.dot_dimension_numbers<[1], [0], [0], [1], [0, 0, 1, 1], [], []>} : vector<16x96xf32>, vector<96x256xf32>, vector<16x256xf32> -> vector<16x256xf32>
    %6 = vector.broadcast %0 : vector<1x256xf32> to vector<16x256xf32>
    %7 = arith.addf %5, %6 : vector<16x256xf32>
    %cst_7 = arith.constant 0.000000e+00 : f32
    %8 = vector.broadcast %cst_7 : f32 to vector<16x256xf32>
    %9 = arith.maximumf %7, %8 : vector<16x256xf32>
    %c0_8 = arith.constant 0 : index
    %c0_9 = arith.constant 0 : index
    %10 = vector.load %arg5[%c0_8, %c0_9] : memref<256x128xf32, #tpu.memory_space<vmem>>, vector<256x128xf32>
    %cst_10 = arith.constant dense<0.000000e+00> : vector<16x128xf32>
    %11 = tpu.matmul %9, %10, %cst_10 {dimension_numbers = #tpu.dot_dimension_numbers<[1], [0], [0], [1], [0, 0, 1, 1], [], []>} : vector<16x256xf32>, vector<256x128xf32>, vector<16x128xf32> -> vector<16x128xf32>
    %12 = vector.broadcast %1 : vector<1x128xf32> to vector<16x128xf32>
    %13 = arith.addf %11, %12 : vector<16x128xf32>
    %14 = math.tanh %13 : vector<16x128xf32>
    %c0_11 = arith.constant 0 : index
    %c0_12 = arith.constant 0 : index
    %c0_13 = arith.constant 0 : index
    %15 = vector.load %arg2[%c0_11, %c0_12, %c0_13] : memref<1x128x8xf32, #tpu.memory_space<vmem>>, vector<1x128x8xf32>
    %16 = vector.shape_cast %15 : vector<1x128x8xf32> to vector<128x8xf32>
    %cst_14 = arith.constant dense<0.000000e+00> : vector<16x8xf32>
    %17 = tpu.matmul %14, %16, %cst_14 {dimension_numbers = #tpu.dot_dimension_numbers<[1], [0], [0], [1], [0, 0, 1, 1], [], []>} : vector<16x128xf32>, vector<128x8xf32>, vector<16x8xf32> -> vector<16x8xf32>
    %cst_15 = arith.constant 0.0883883461 : f32
    %18 = vector.broadcast %cst_15 : f32 to vector<16x8xf32>
    %19 = arith.mulf %17, %18 : vector<16x8xf32>
    %cst_16 = arith.constant dense<0xFF800000> : vector<16xf32>
    %20 = vector.multi_reduction <maximumf>, %19, %cst_16 [1] : vector<16x8xf32> to vector<16xf32>
    %21 = vector.shape_cast %20 : vector<16xf32> to vector<16x1xf32>
    %22 = vector.broadcast %21 : vector<16x1xf32> to vector<16x8xf32>
    %23 = arith.subf %19, %22 : vector<16x8xf32>
    %24 = math.exp %23 : vector<16x8xf32>
    %cst_17 = arith.constant dense<0.000000e+00> : vector<16xf32>
    %25 = vector.multi_reduction <add>, %24, %cst_17 [1] : vector<16x8xf32> to vector<16xf32>
    %26 = vector.shape_cast %25 : vector<16xf32> to vector<16x1xf32>
    %27 = tpu.reciprocal %26 : vector<16x1xf32> -> vector<16x1xf32>
    %28 = vector.broadcast %27 : vector<16x1xf32> to vector<16x8xf32>
    %29 = arith.mulf %24, %28 : vector<16x8xf32>
    %c0_18 = arith.constant 0 : index
    %c0_19 = arith.constant 0 : index
    %c0_20 = arith.constant 0 : index
    %30 = vector.load %arg3[%c0_18, %c0_19, %c0_20] : memref<1x8x128xf32, #tpu.memory_space<vmem>>, vector<1x8x128xf32>
    %31 = vector.shape_cast %30 : vector<1x8x128xf32> to vector<8x128xf32>
    %cst_21 = arith.constant dense<0.000000e+00> : vector<16x128xf32>
    %32 = tpu.matmul %29, %31, %cst_21 {dimension_numbers = #tpu.dot_dimension_numbers<[1], [0], [0], [1], [0, 0, 1, 1], [], []>} : vector<16x8xf32>, vector<8x128xf32>, vector<16x128xf32> -> vector<16x128xf32>
    %c0_22 = arith.constant 0 : index
    %c0_23 = arith.constant 0 : index
    %33 = vector.load %arg6[%c0_22, %c0_23] : memref<128x128xf32, #tpu.memory_space<vmem>>, vector<128x128xf32>
    %cst_24 = arith.constant dense<0.000000e+00> : vector<16x128xf32>
    %34 = tpu.matmul %32, %33, %cst_24 {dimension_numbers = #tpu.dot_dimension_numbers<[1], [0], [0], [1], [0, 0, 1, 1], [], []>} : vector<16x128xf32>, vector<128x128xf32>, vector<16x128xf32> -> vector<16x128xf32>
    %35 = vector.broadcast %2 : vector<1x128xf32> to vector<16x128xf32>
    %36 = arith.addf %34, %35 : vector<16x128xf32>
    %c0_25 = arith.constant 0 : index
    %c0_26 = arith.constant 0 : index
    %37 = vector.load %arg8[%c0_25, %c0_26] : memref<16x128xf32, #tpu.memory_space<vmem>>, vector<16x128xf32>
    tpu.vector_store %arg8[%c0_25, %c0_26], %36 {strides = array<i32>} : memref<16x128xf32, #tpu.memory_space<vmem>>, vector<16x128xf32>,
    return
  }
  func.func @transform_0(%arg0: i32) -> (i32, i32) {
    %c0_i32 = arith.constant 0 : i32
    %c0_i32_0 = arith.constant 0 : i32
    return %arg0, %c0_i32 : i32, i32
  }
  func.func @transform_1(%arg0: i32) -> (i32, i32, i32) {
    %c0_i32 = arith.constant 0 : i32
    %c0_i32_0 = arith.constant 0 : i32
    %c0_i32_1 = arith.constant 0 : i32
    return %arg0, %c0_i32, %c0_i32_0 : i32, i32, i32
  }
  func.func @transform_2(%arg0: i32) -> (i32, i32, i32) {
    %c0_i32 = arith.constant 0 : i32
    %c0_i32_0 = arith.constant 0 : i32
    %c0_i32_1 = arith.constant 0 : i32
    return %arg0, %c0_i32, %c0_i32_0 : i32, i32, i32
  }
  func.func @transform_3(%arg0: i32) -> (i32, i32) {
    %c0_i32 = arith.constant 0 : i32
    %c0_i32_0 = arith.constant 0 : i32
    %c0_i32_1 = arith.constant 0 : i32
    return %c0_i32, %c0_i32_0 : i32, i32
  }
  func.func @transform_4(%arg0: i32) -> (i32, i32) {
    %c0_i32 = arith.constant 0 : i32
    %c0_i32_0 = arith.constant 0 : i32
    %c0_i32_1 = arith.constant 0 : i32
    return %c0_i32, %c0_i32_0 : i32, i32
  }
  func.func @transform_5(%arg0: i32) -> (i32, i32) {
    %c0_i32 = arith.constant 0 : i32
    %c0_i32_0 = arith.constant 0 : i32
    %c0_i32_1 = arith.constant 0 : i32
    return %c0_i32, %c0_i32_0 : i32, i32
  }
  func.func @transform_6(%arg0: i32) -> (i32, i32) {
    %c0_i32 = arith.constant 0 : i32
    %c0_i32_0 = arith.constant 0 : i32
    %c0_i32_1 = arith.constant 0 : i32
    return %c0_i32, %c0_i32_0 : i32, i32
  }
  func.func @transform_7(%arg0: i32) -> (i32, i32) {
    %c0_i32 = arith.constant 0 : i32
    %c0_i32_0 = arith.constant 0 : i32
    return %arg0, %c0_i32 : i32, i32
  }
}

</mosaic_0001>

<bundles_post_ra>
// kernel: _apl_forward_logits.1
= control target key start
LH: loop header
LB: loop body
LE: loop exit
PB: predicated region body
PF: predicated region fallthrough
CT: control target
= control target key end

     0   :  { %s1182_s24 = smov 0   ;;  %s1480_s0 = inlined_call_operand.vmem [shape: f32[32,96], index: 0, kind: input, shape index: {}]   ;;  %s1481_s1 = inlined_call_operand.vmem [shape: f32[2,128,8], index: 1, kind: input, shape index: {}]   ;;  %s1482_s2 = inlined_call_operand.vmem [shape: f32[2,8,128], index: 2, kind: input, shape index: {}]   ;;  %s1483_s3 = inlined_call_operand.vmem [shape: f32[96,256], index: 3, kind: input, shape index: {}]   ;;  %s1484_s4 = inlined_call_operand.vmem [shape: f32[256,128], index: 4, kind: input, shape index: {}]   ;;  %s1485_s5 = inlined_call_operand.vmem [shape: f32[128,128], index: 5, kind: input, shape index: {}]   ;;  %s1486_s6 = inlined_call_operand.vmem [shape: f32[1,512], index: 6, kind: input, shape index: {}]   ;;  %s1487_s7 = inlined_call_operand.vmem [shape: f32[32,128], index: 7, kind: output, shape index: {}]  }
   0x1 LB: > { %s1188_s25 = sadd.s32 4294967295, %s1139_s24   ;;  %p943_p0 = scmp.ge.s32.totalorder %s1139_s24, 1  ;;  %s1139_s24 = sphi %s1182_s24, %s17_s24  }
   0x2   : > { %p257_p1 = scmp.lt.s32.totalorder %s1139_s24, 3 }
   0x4   : > { %p258_p2 = pnand %p943_p0, %p257_p1 }
   0x5   : > { %s944_s19 = sshll.u32 (!%p258_p2), %s1188_s25, 1  ;;  %p304_p4 = scmp.lt.s32.totalorder (!%p258_p2), %s1188_s25, 1 }
   0x6   : > { %261 = sbr.rel (%p258_p2) target bundleno = 1360 (0x550), region = 48  ;;  %p1230_p3 = scmp.lt.s32.totalorder (!%p258_p2), %s944_s19, 3 }
   0xb   : > { %v347_v0 = vld [vmem:[%s1483_s3 + $0xb8] sm:$0xff]  ;;  %v346_v1 = vld [vmem:[%s1483_s3 + $0xb0] sm:$0xff]  ;;  %v345_v2 = vld [vmem:[%s1483_s3 + $0xa8] sm:$0xff]  ;;  %v1141_v4 = vmov 0.0   ;;  %s1490_s19 = smov (!%p1230_p3, %s944_s19), 3  ;;  %vm359_vm0 = vcmask 785408   ;;  %v349_v63 = vlaneseq }
   0xc   : > { %374 = vmatprep.subr.mxu0 %v347_v0  ;;  %v344_v3 = vld [vmem:[%s1483_s3 + $0xa0] sm:$0xff]  ;;  %430 = vmatprep.mubr.f32.mxu0 %v1141_v4  ;;  %v343_v5 = vld [vmem:[%s1483_s3 + $0x98] sm:$0xff]  ;;  %v342_v6 = vld [vmem:[%s1483_s3 + $0x90] sm:$0xff]  ;;  %s945_s23 = sshll.u32 %s1490_s19, 3  ;;  %s1492_s25 = smov (!%p304_p4, %s1188_s25), 1  ;;  %vm655_vm1 = vcmask 64512  }
   0xd   : > { %375 = vmatpush1.msra.mxu0 %v346_v1  ;;  %v341_v7 = vld [vmem:[%s1483_s3 + $0x88] sm:$0xff]  ;;  %v340_v8 = vld [vmem:[%s1483_s3 + $0x80] sm:$0xff]  ;;  %v339_v9 = vld [vmem:[%s1483_s3 + $0x78] sm:$0xff]  ;;  %s302_s17 = scalar_lea.vmem %s1480_s0, %s945_s23  ;;  %s959_s27 = sshll.u32 %s1492_s25, 7  ;;  %v350_v0 = vshrl.u32 %v349_v63, 7 }
   0xe   : > { %376 = vmatprep.subr.mxu0 %v345_v2  ;;  %v338_v10 = vld [vmem:[%s1483_s3 + $0x70] sm:$0xff]  ;;  %v337_v11 = vld [vmem:[%s1483_s3 + $0x68] sm:$0xff]  ;;  %v336_v12 = vld [vmem:[%s1483_s3 + $0x60] sm:$0xff]  ;;  %s1387_s29 = scalar_lea.vmem %s1481_s1, %s959_s27  ;;  %s948_s12 = sshll.u32 %s1492_s25, 3 }
   0xf   : > { %377 = vmatpush1.msra.mxu0 %v344_v3  ;;  %v478_v13 = vld [vmem:[%s1484_s4 + $0xf8] sm:$0xff]  ;;  %v477_v15 = vld [vmem:[%s1484_s4 + $0xf0] sm:$0xff]  ;;  %v476_v18 = vld [vmem:[%s1484_s4 + $0xe8] sm:$0xff]  ;;  %v351_v1 = vsub.s32 0, %v350_v0  ;;  %v355_v3 = vsub.s32 1, %v350_v0  ;;  %s312_s14 = scalar_lea.vmem %s1482_s2, %s948_s12  ;;  %s317_s12 = scalar_lea.vmem %s1487_s7, %s945_s23 }
  0x10   : > { %378 = vmatprep.subr.mxu0 %v343_v5  ;;  %960 = vmatprep.subr.mxu1 %v478_v13  ;;  %v462_v14 = vld [vmem:[%s1484_s4 + $0x78] sm:$0xff]  ;;  %v461_v16 = vld [vmem:[%s1484_s4 + $0x70] sm:$0xff]  ;;  %v460_v20 = vld [vmem:[%s1484_s4 + $0x68] sm:$0xff] }
  0x11   : > { %379 = vmatpush1.msra.mxu0 %v342_v6  ;;  %v335_v17 = vld [vmem:[%s1483_s3 + $0x58] sm:$0xff]  ;;  %961 = vmatpush3.msra.mxu1 %v462_v14  ;;  %v334_v19 = vld [vmem:[%s1483_s3 + $0x50] sm:$0xff]  ;;  %v333_v21 = vld [vmem:[%s1483_s3 + $0x48] sm:$0xff] }
  0x12   : > { %380 = vmatprep.subr.mxu0 %v341_v7  ;;  %962 = vmatprep.subr.mxu1 %v477_v15  ;;  %v475_v22 = vld [vmem:[%s1484_s4 + $0xe0] sm:$0xff]  ;;  %v331_v25 = vld [vmem:[%s1483_s3 + $0x38] sm:$0xff]  ;;  %v330_v27 = vld [vmem:[%s1483_s3 + $0x30] sm:$0xff] }
  0x13   : > { %381 = vmatpush1.msra.mxu0 %v340_v8  ;;  %963 = vmatpush3.msra.mxu1 %v461_v16  ;;  %v332_v23 = vld [vmem:[%s1483_s3 + $0x40] sm:$0xff]  ;;  %v474_v26 = vld [vmem:[%s1484_s4 + $0xd8] sm:$0xff]  ;;  %v329_v29 = vld [vmem:[%s1483_s3 + $0x28] sm:$0xff] }
  0x14   : > { %382 = vmatprep.subr.mxu0 %v339_v9  ;;  %964 = vmatprep.subr.mxu1 %v476_v18  ;;  %v459_v24 = vld [vmem:[%s1484_s4 + $0x60] sm:$0xff]  ;;  %v458_v28 = vld [vmem:[%s1484_s4 + $0x58] sm:$0xff]  ;;  %v473_v30 = vld [vmem:[%s1484_s4 + $0xd0] sm:$0xff] }
  0x15   : > { %383 = vmatpush1.msra.mxu0 %v338_v10  ;;  %965 = vmatpush3.msra.mxu1 %v460_v20  ;;  %v328_v31 = vld [vmem:[%s1483_s3 + $0x20] sm:$0xff]  ;;  %v457_v32 = vld [vmem:[%s1484_s4 + $0x50] sm:$0xff]  ;;  %v327_v33 = vld [vmem:[%s1483_s3 + $0x18] sm:$0xff] }
  0x16   : > { %384 = vmatprep.subr.mxu0 %v337_v11  ;;  %966 = vmatprep.subr.mxu1 %v475_v22  ;;  %v472_v34 = vld [vmem:[%s1484_s4 + $0xc8] sm:$0xff]  ;;  %v326_v35 = vld [vmem:[%s1483_s3 + $0x10] sm:$0xff]  ;;  %v471_v38 = vld [vmem:[%s1484_s4 + $0xc0] sm:$0xff] }
  0x17   : > { %385 = vmatpush1.msra.mxu0 %v336_v12  ;;  %967 = vmatpush3.msra.mxu1 %v459_v24  ;;  %v456_v36 = vld [vmem:[%s1484_s4 + $0x48] sm:$0xff]  ;;  %v324_v39 = vld [vmem:[%s1483_s3] sm:$0xff]  ;;  %v470_v42 = vld [vmem:[%s1484_s4 + $0xb8] sm:$0xff] }
  0x18   : > { %386 = vmatprep.subr.mxu0 %v335_v17  ;;  %968 = vmatprep.subr.mxu1 %v474_v26  ;;  %v325_v37 = vld [vmem:[%s1483_s3 + $0x8] sm:$0xff]  ;;  %v455_v40 = vld [vmem:[%s1484_s4 + $0x40] sm:$0xff]  ;;  %v454_v43 = vld [vmem:[%s1484_s4 + $0x38] sm:$0xff] }
  0x19   : > { %387 = vmatpush1.msra.mxu0 %v334_v19  ;;  %969 = vmatpush3.msra.mxu1 %v458_v28  ;;  %v322_v41 = vld [vmem:[%s302_s17] sm:$0xff]  ;;  %v469_v44 = vld [vmem:[%s1484_s4 + $0xb0] sm:$0xff]  ;;  %v323_v46 = vld [vmem:[%s302_s17 + $0x8] sm:$0xff] }
  0x1a   : > { %388 = vmatprep.subr.mxu0 %v333_v21  ;;  %970 = vmatprep.subr.mxu1 %v473_v30  ;;  %v453_v45 = vld [vmem:[%s1484_s4 + $0x30] sm:$0xff]  ;;  %v468_v47 = vld [vmem:[%s1484_s4 + $0xa8] sm:$0xff]  ;;  %v467_v49 = vld [vmem:[%s1484_s4 + $0xa0] sm:$0xff] }
  0x1b   : > { %389 = vmatpush1.msra.mxu0 %v332_v23  ;;  %971 = vmatpush3.msra.mxu1 %v457_v32  ;;  %v452_v48 = vld [vmem:[%s1484_s4 + $0x28] sm:$0xff]  ;;  %v451_v50 = vld [vmem:[%s1484_s4 + $0x20] sm:$0xff]  ;;  %v466_v51 = vld [vmem:[%s1484_s4 + $0x98] sm:$0xff] }
  0x1c   : > { %390 = vmatprep.subr.mxu0 %v331_v25  ;;  %972 = vmatprep.subr.mxu1 %v472_v34  ;;  %v450_v52 = vld [vmem:[%s1484_s4 + $0x18] sm:$0xff]  ;;  %v465_v53 = vld [vmem:[%s1484_s4 + $0x90] sm:$0xff]  ;;  %v464_v55 = vld [vmem:[%s1484_s4 + $0x88] sm:$0xff] }
  0x1d   : > { %391 = vmatpush1.msra.mxu0 %v330_v27  ;;  %973 = vmatpush3.msra.mxu1 %v456_v36  ;;  %v449_v54 = vld [vmem:[%s1484_s4 + $0x10] sm:$0xff]  ;;  %v448_v56 = vld [vmem:[%s1484_s4 + $0x8] sm:$0xff]  ;;  %v463_v57 = vld [vmem:[%s1484_s4 + $0x80] sm:$0xff] }
  0x1e   : > { %392 = vmatprep.subr.mxu0 %v329_v29  ;;  %974 = vmatprep.subr.mxu1 %v471_v38  ;;  %v447_v58 = vld [vmem:[%s1484_s4] sm:$0xff]  ;;  %v577_v59 = vld [vmem:[%s1387_s29 + $0x78] sm:$0xff]  ;;  %v576_v60 = vld [vmem:[%s1387_s29 + $0x70] sm:$0xff] }
  0x1f   : > { %393 = vmatpush1.msra.mxu0 %v328_v31  ;;  %975 = vmatpush3.msra.mxu1 %v455_v40  ;;  %v575_v61 = vld [vmem:[%s1387_s29 + $0x68] sm:$0xff]  ;;  %v574_v62 = vld [vmem:[%s1387_s29 + $0x60] sm:$0xff]  ;;  %v573_v18 = vld [vmem:[%s1387_s29 + $0x58] sm:$0xff] }
  0x20   : > { %394 = vmatprep.subr.mxu0 %v327_v33  ;;  %976 = vmatprep.subr.mxu1 %v470_v42  ;;  %v319_v2 = vld [vmem:[%s1486_s6] sm:$0x3]  ;;  %v572_v19 = vld [vmem:[%s1387_s29 + $0x50] sm:$0xff]  ;;  %v571_v20 = vld [vmem:[%s1387_s29 + $0x48] sm:$0xff] }
  0x21   : > { %395 = vmatpush1.msra.mxu0 %v326_v35  ;;  %977 = vmatpush3.msra.mxu1 %v454_v43  ;;  %v356_v5 = vrot.slane %v319_v2, %v355_v3  ;;  %v570_v21 = vld [vmem:[%s1387_s29 + $0x40] sm:$0xff]  ;;  %v569_v22 = vld [vmem:[%s1387_s29 + $0x38] sm:$0xff]  ;;  %v568_v23 = vld [vmem:[%s1387_s29 + $0x30] sm:$0xff] }
  0x22   : > { %396 = vmatprep.subr.mxu0 %v325_v37  ;;  %978 = vmatprep.subr.mxu1 %v469_v44  ;;  %v567_v24 = vld [vmem:[%s1387_s29 + $0x28] sm:$0xff]  ;;  %v566_v25 = vld [vmem:[%s1387_s29 + $0x20] sm:$0xff]  ;;  %v565_v26 = vld [vmem:[%s1387_s29 + $0x18] sm:$0xff] }
  0x23   : > { %397 = vmatpush1.msra.mxu0 %v324_v39  ;;  %979 = vmatpush3.msra.mxu1 %v453_v45  ;;  %v564_v27 = vld [vmem:[%s1387_s29 + $0x10] sm:$0xff]  ;;  %v563_v28 = vld [vmem:[%s1387_s29 + $0x8] sm:$0xff]  ;;  %v562_v29 = vld [vmem:[%s1387_s29] sm:$0xff] }
  0x24   : > { %951 = vmatmul.mubr.msk.f32.vlgmr.msra.gmra.mxu0 %vm359_vm0, %v322_v41  ;;  %980 = vmatprep.subr.mxu1 %v468_v47  ;;  %v953_v31 = vld [vmem:[%s1486_s6 + $0x2] ss:$0 sm:$0xff]  ;;  %v770_v63 = vld [vmem:[%s1485_s5 + $0x50] sm:$0xff]  ;;  %v769_v0 = vld [vmem:[%s1485_s5 + $0x48] sm:$0xff] }
  0x25   : > { %436 = vmatprep.mubr.f32.mxu0 %v1141_v4  ;;  %981 = vmatpush3.msra.mxu1 %v452_v48  ;;  %v352_v4 = vrot.slane %v319_v2, %v351_v1  ;;  %v768_v1 = vld [vmem:[%s1485_s5 + $0x40] sm:$0xff]  ;;  %v767_v2 = vld [vmem:[%s1485_s5 + $0x38] sm:$0xff]  ;;  %v766_v3 = vld [vmem:[%s1485_s5 + $0x30] sm:$0xff] }
  0x26   : > { %982 = vmatprep.subr.mxu1 %v467_v49  ;;  %1037 = vmatprep.subr.mxu0 %v577_v59 }
  0x27   : > { %983 = vmatpush3.msra.mxu1 %v451_v50  ;;  %1038 = vmatpush3.msra.mxu0 %v577_v59  ;;  %v774_v59 = vld [vmem:[%s1485_s5 + $0x70] sm:$0xff] }
  0x28   : > { %952 = vmatmul.mubr.msk.f32.gmra.mxu0 %vm359_vm0, %v323_v46  ;;  %984 = vmatprep.subr.mxu1 %v466_v51 }
  0x29   : > { %985 = vmatpush3.msra.mxu1 %v450_v52  ;;  %1039 = vmatprep.subr.mxu0 %v576_v60 }
  0x2a   : > { %986 = vmatprep.subr.mxu1 %v465_v53  ;;  %1040 = vmatpush3.msra.mxu0 %v576_v60  ;;  %v773_v60 = vld [vmem:[%s1485_s5 + $0x68] sm:$0xff] }
  0x2b   : > { %987 = vmatpush3.msra.mxu1 %v449_v54  ;;  %1041 = vmatprep.subr.mxu0 %v575_v61 }
  0x2c   : > { %988 = vmatprep.subr.mxu1 %v464_v55  ;;  %1042 = vmatpush3.msra.mxu0 %v575_v61  ;;  %v772_v61 = vld [vmem:[%s1485_s5 + $0x60] sm:$0xff] }
  0x2d   : > { %989 = vmatpush3.msra.mxu1 %v448_v56  ;;  %1043 = vmatprep.subr.mxu0 %v574_v62 }
  0x2e   : > { %990 = vmatprep.subr.mxu1 %v463_v57  ;;  %1044 = vmatpush3.msra.mxu0 %v574_v62  ;;  %v678_v57 = vld [vmem:[%s312_s14] sm:$0xff]  ;;  %v771_v62 = vld [vmem:[%s1485_s5 + $0x58] sm:$0xff] }
  0x2f   : > { %991 = vmatpush3.msra.mxu1 %v447_v58  ;;  %1045 = vmatprep.subr.mxu0 %v573_v18  ;;  %v775_v58 = vld [vmem:[%s1485_s5 + $0x78] sm:$0xff] }
  0x30   : > { %1046 = vmatpush3.msra.mxu0 %v573_v18  ;;  %1077 = vmatprep.subr.mxu1 %v775_v58 }
  0x31   : > { %1047 = vmatprep.subr.mxu0 %v572_v19 }
  0x32   : > { %1048 = vmatpush3.msra.mxu0 %v572_v19  ;;  %v956_v19 = vld [vmem:[%s1486_s6 + $0x3] ss:$0 sm:$0xff] }
  0x33   : > { %1049 = vmatprep.subr.mxu0 %v571_v20 }
  0x34   : > { %1050 = vmatpush3.msra.mxu0 %v571_v20 }
  0x35   : > { %1051 = vmatprep.subr.mxu0 %v570_v21 }
  0x36   : > { %1052 = vmatpush3.msra.mxu0 %v570_v21 }
  0x37   : > { %1053 = vmatprep.subr.mxu0 %v569_v22 }
  0x38   : > { %1054 = vmatpush3.msra.mxu0 %v569_v22 }
  0x39   : > { %1055 = vmatprep.subr.mxu0 %v568_v23 }
  0x3a   : > { %1056 = vmatpush3.msra.mxu0 %v568_v23 }
  0x3b   : > { %1057 = vmatprep.subr.mxu0 %v567_v24 }
  0x3c   : > { %1058 = vmatpush3.msra.mxu0 %v567_v24 }
  0x3d   : > { %1059 = vmatprep.subr.mxu0 %v566_v25 }
  0x3e   : > { %1060 = vmatpush3.msra.mxu0 %v566_v25 }
  0x3f   : > { %1061 = vmatprep.subr.mxu0 %v565_v26 }
  0x40   : > { %1062 = vmatpush3.msra.mxu0 %v565_v26 }
  0x41   : > { %1063 = vmatprep.subr.mxu0 %v564_v27 }
  0x42   : > { %1064 = vmatpush3.msra.mxu0 %v564_v27 }
  0x43   : > { %1065 = vmatprep.subr.mxu0 %v563_v28 }
  0x44   : > { %1066 = vmatpush3.msra.mxu0 %v563_v28 }
  0x45   : > { %1067 = vmatprep.subr.mxu0 %v562_v29 }
  0x46   : > { %1068 = vmatpush3.msra.mxu0 %v562_v29 }
  0x47   : > { %1072 = vmatprep.subr.mxu0 %v678_v57 }
  0xe4   : > { %v432_v6 = vpop.f32.mrf.mxu0 }
  0xe5   : > { %v433_v7 = vadd.f32 %v432_v6, %v352_v4  ;;  %v763_v6 = vld [vmem:[%s1485_s5 + $0x18] sm:$0xff] }
  0xe6   : > { %v434_v8 = vpop.f32.mrf.mxu0 }
  0xe7   : > { %v435_v9 = vadd.f32 %v434_v8, %v356_v5  ;;  %v443_v12 = vmax.f32 %v433_v7, 0.0  ;;  %v762_v7 = vld [vmem:[%s1485_s5 + $0x10] sm:$0xff] }
  0xe8   : > { %v438_v10 = vpop.f32.mrf.mxu0 }
  0xe9   : > { %v444_v11 = vmax.f32 %v435_v9, 0.0  ;;  %v439_v13 = vadd.f32 %v438_v10, %v352_v4  ;;  %v765_v4 = vld [vmem:[%s1485_s5 + $0x28] sm:$0xff] }
  0xea   : > { %v440_v14 = vpop.f32.mrf.mxu0 }
  0xeb   : > { %v441_v15 = vadd.f32 %v440_v14, %v356_v5  ;;  %549 = vmatprep.mubr.f32.mxu1 %v444_v11  ;;  %v445_v17 = vmax.f32 %v439_v13, 0.0  ;;  %v764_v5 = vld [vmem:[%s1485_s5 + $0x20] sm:$0xff]  ;;  %v761_v14 = vld [vmem:[%s1485_s5 + $0x8] sm:$0xff] }
  0xec   : > { %550 = vmatmul.mubr.f32.vlgmr.msra.gmra.mxu1 %v443_v12 }
  0xed   : > { %v446_v16 = vmax.f32 %v441_v15, 0.0  ;;  %1078 = vmatpush3.msra.mxu1 %v775_v58  ;;  %v760_v15 = vld [vmem:[%s1485_s5] sm:$0xff] }
  0xee   : > { %1079 = vmatprep.subr.mxu1 %v774_v59 }
  0xef   : > { %554 = vmatprep.mubr.f32.mxu1 %v446_v16  ;;  %1080 = vmatpush3.msra.mxu1 %v774_v59 }
  0xf0   : > { %555 = vmatmul.mubr.f32.gmra.mxu1 %v445_v17  ;;  %1081 = vmatprep.subr.mxu1 %v773_v60 }
  0xf1   : > { %1082 = vmatpush3.msra.mxu1 %v773_v60 }
  0xf2   : > { %1083 = vmatprep.subr.mxu1 %v772_v61 }
  0xf3   : > { %1084 = vmatpush3.msra.mxu1 %v772_v61 }
  0xf4   : > { %1085 = vmatprep.subr.mxu1 %v771_v62 }
  0xf5   : > { %1086 = vmatpush3.msra.mxu1 %v771_v62 }
  0xf6   : > { %1087 = vmatprep.subr.mxu1 %v770_v63 }
  0xf7   : > { %1088 = vmatpush3.msra.mxu1 %v770_v63 }
  0xf8   : > { %1089 = vmatprep.subr.mxu1 %v769_v0 }
  0xf9   : > { %1090 = vmatpush3.msra.mxu1 %v769_v0 }
  0xfa   : > { %1091 = vmatprep.subr.mxu1 %v768_v1 }
  0xfb   : > { %1092 = vmatpush3.msra.mxu1 %v768_v1 }
  0xfc   : > { %1093 = vmatprep.subr.mxu1 %v767_v2 }
  0xfd   : > { %1094 = vmatpush3.msra.mxu1 %v767_v2 }
  0xfe   : > { %1095 = vmatprep.subr.mxu1 %v766_v3 }
  0xff   : > { %1096 = vmatpush3.msra.mxu1 %v766_v3 }
 0x100   : > { %1097 = vmatprep.subr.mxu1 %v765_v4 }
 0x101   : > { %1098 = vmatpush3.msra.mxu1 %v765_v4 }
 0x102   : > { %1099 = vmatprep.subr.mxu1 %v764_v5 }
 0x103   : > { %1100 = vmatpush3.msra.mxu1 %v764_v5 }
 0x104   : > { %1101 = vmatprep.subr.mxu1 %v763_v6 }
 0x105   : > { %1102 = vmatpush3.msra.mxu1 %v763_v6 }
 0x106   : > { %1103 = vmatprep.subr.mxu1 %v762_v7 }
 0x107   : > { %1104 = vmatpush3.msra.mxu1 %v762_v7 }
 0x108   : > { %1105 = vmatprep.subr.mxu1 %v761_v14 }
 0x109   : > { %1106 = vmatpush3.msra.mxu1 %v761_v14 }
 0x10a   : > { %1107 = vmatprep.subr.mxu1 %v760_v15 }
 0x10b   : > { %1108 = vmatpush3.msra.mxu1 %v760_v15 }
 0x1ac   : > { %v992_v30 = vpop.f32.mrf.mxu1 }
 0x1ae   : > { %v993_v32 = vpop.f32.mrf.mxu1 }
 0x1af   : > { %v994_v33 = vadd.f32 %v993_v32, %v992_v30 }
 0x1b0   : > { %v995_v34 = vpop.f32.mrf.mxu1 }
 0x1b1   : > { %v552_v35 = vadd.f32 %v994_v33, %v953_v31 }
 0x1b2   : > { %v996_v36 = vpop.f32.mrf.mxu1 }
 0x1b3   : > { %1121 = vtanh.f32 %v552_v35  ;;  %v997_v37 = vadd.f32 %v996_v36, %v995_v34 }
 0x1b5   : > { %v557_v38 = vadd.f32 %v997_v37, %v953_v31 }
 0x1b7   : > { %1123 = vtanh.f32 %v557_v38 }
 0x1c0   : > { %v1122_v39 = vpop.eup %1121 }
 0x1c1   : > { %1069 = vmatprep.mubr.f32.mxu0 %v1122_v39 }
 0x1c4   : > { %v1124_v40 = vpop.eup %1123 }
 0x1c5   : > { %1070 = vmatmul.mubr.f32.vlgmr.msra.gmra.mxu0 %v1124_v40 }
 0x1c6   : > { %1073 = vmatpush3.msra.mxu0 %v678_v57 }
 0x285   : > { %v1071_v41 = vpop.f32.mrf.mxu0 }
 0x286   : > { %v654_v44 = vmul.f32 0.088388346, %v1071_v41 }
 0x287   : > { %v644_v42 = vpop.f32.mrf.mxu0 }
 0x288   : > { %v653_v43 = vmul.f32 0.088388346, %v644_v42  ;;  %v659_v46 = vsel %vm655_vm1, %v654_v44, -inf }
 0x28a   : > { %v656_v45 = vsel %vm655_vm1, %v653_v43, -inf }
 0x28b   : > { %657 = vmax.xlane.f32.xlu0 %v656_v45 }
 0x28f   : > { %660 = vmax.xlane.f32.xlu0 %v659_v46 }
 0x314   : > { %v658_v47 = vpop.xlane.xlu0 %657 }
 0x315   : > { %v662_v48 = vsub.f32 %v653_v43, %v658_v47 }
 0x317   : > { %v664_v49 = vmul.f32 1.442695, %v662_v48 }
 0x318   : > { %v661_v50 = vpop.xlane.xlu0 %660 }
 0x319   : > { %1125 = vpow2.f32 %v664_v49  ;;  %v663_v51 = vsub.f32 %v654_v44, %v661_v50 }
 0x31b   : > { %v666_v52 = vmul.f32 1.442695, %v663_v51 }
 0x31d   : > { %1127 = vpow2.f32 %v666_v52 }
 0x326   : > { %v1126_v53 = vpop.eup %1125 }
 0x327   : > { %v668_v54 = vsel %vm655_vm1, %v1126_v53, 0.0 }
 0x328   : > { %669 = vadd.xlane.f32.xlu1 %v668_v54 }
 0x32a   : > { %v1128_v55 = vpop.eup %1127 }
 0x32b   : > { %v671_v56 = vsel %vm655_vm1, %v1128_v55, 0.0 }
 0x32c   : > { %672 = vadd.xlane.f32.xlu1 %v671_v56 }
 0x3b1   : > { %v670_v8 = vpop.xlane.xlu1 %669 }
 0x3b2   : > { %1129 = vrcp.f32 %v670_v8 }
 0x3b5   : > { %v673_v9 = vpop.xlane.xlu1 %672 }
 0x3b6   : > { %1131 = vrcp.f32 %v673_v9 }
 0x3bf   : > { %v1130_v10 = vpop.eup %1129 }
 0x3c0   : > { %v676_v11 = vmul.f32 %v1130_v10, %v1126_v53 }
 0x3c2   : > { %1074 = vmatprep.mubr.msk.f32.mxu0 %vm655_vm1, %v676_v11 }
 0x3c3   : > { %v1132_v12 = vpop.eup %1131 }
 0x3c4   : > { %v677_v13 = vmul.f32 %v1132_v12, %v1128_v55 }
 0x3c6   : > { %1075 = vmatmul.mubr.msk.f32.vlgmr.msra.gmra.mxu0 %vm655_vm1, %v677_v13 }
 0x486   : > { %v1076_v16 = vpop.f32.mrf.mxu0 }
 0x488   : > { %v751_v17 = vpop.f32.mrf.mxu0 }
 0x489   : > { %1109 = vmatprep.mubr.f32.mxu1 %v751_v17 }
 0x48a   : > { %1110 = vmatmul.mubr.f32.vlgmr.msra.gmra.mxu1 %v1076_v16 }
 0x54a   : > { %v1111_v18 = vpop.f32.mrf.mxu1 }
 0x54b   : > { %v854_v22 = vadd.f32 %v1111_v18, %v956_v19 }
 0x54c   : > { %v848_v20 = vpop.f32.mrf.mxu1 }
 0x54d   : > { %v849_v21 = vadd.f32 %v956_v19, %v848_v20  ;;  %858 = vst [vmem:[%s317_s12 + $0x8] sm:$0xff] %v854_v22 }
 0x54f   : > { %857 = vst [vmem:[%s317_s12] sm:$0xff] %v849_v21 }
 0x550 PF: > { %s17_s24 = sadd.s32 1, %s1139_s24  }
 0x551   : > { %p14_p5 = scmp.ge.s32.totalorder %s17_s24, 4  }
 0x553   :  { %16 = sbr.rel (!%p14_p5) target bundleno = 1 (0x1), region = 84 }

</bundles_post_ra>
